<compile_context>
chip_gen: v7x
topology: tpu7x:2x2x1
jax: 0.10.0
libtpu: 0.0.40
codegen_flags: <defaults>
</compile_context>

<pallas_src>
import functools

import jax
import jax.numpy as jnp
from jax.experimental import pallas as pl
from jax.experimental.pallas import tpu as pltpu


def _round_up(v, m):
    return (v + m - 1) // m * m


def _block_bytes(sub, lane, itemsize):
    sub_align = 8 * (4 // itemsize)          # 8 for f32, 16 for bf16, 32 for i8
    return _round_up(sub, sub_align) * _round_up(lane, 128) * itemsize


def _largest_dividing_tile(total, target, align):
    """Largest multiple of `align` <= target that divides `total`, else `total`."""
    cand = (min(total, target) // align) * align
    while cand >= align:
        if total % cand == 0:
            return cand
        cand -= align
    return total


def _conv1x1_direct_kernel(x_ref, w_ref, b_ref, o_ref):
    # x_ref: (1, tile_ci, tile_hw)  w_ref: (tile_co, tile_ci)  b_ref: (tile_co, 1)
    acc = jnp.dot(w_ref[...], x_ref[0], preferred_element_type=jnp.float32)
    o_ref[0] = (acc + b_ref[...]).astype(o_ref.dtype)


def _conv1x1_acc_kernel(x_ref, w_ref, b_ref, o_ref, acc_ref):
    # Reduction over C_in tiles on the trailing ("arbitrary") grid axis.
    k = pl.program_id(3)

    @pl.when(k == 0)
    def _():
        acc_ref[...] = jnp.zeros_like(acc_ref)

    acc_ref[...] += jnp.dot(w_ref[...], x_ref[0],
                            preferred_element_type=jnp.float32)

    @pl.when(k == pl.num_programs(3) - 1)
    def _():
        o_ref[0] = (acc_ref[...] + b_ref[...]).astype(o_ref.dtype)


@functools.partial(jax.jit, static_argnames=("compute_dtype",))
def bottleneck_block(x_nchw, weight, bias, *, compute_dtype=None):
    """1x1 Conv2d (BottleNeckBlock.forward) as a Pallas TPU kernel.

    x_nchw : (N, C_in, H, W)
    weight : (C_out, C_in) or (C_out, C_in, 1, 1)
    bias   : (C_out,)
    compute_dtype : None (keep input dtype) or e.g. jnp.bfloat16 to halve HBM
                    bytes (f32 MXU accumulation; keep None on v5e if the f32
                    epilogue matters).
    """
    N, C_in, H, W = x_nchw.shape
    C_out = weight.shape[0]
    HW = H * W
    out_dtype = x_nchw.dtype

    x3 = x_nchw.reshape(N, C_in, HW)            # free reshape, no HBM transpose
    w_mat = weight.reshape(C_out, C_in)
    if compute_dtype is not None:
        x3 = x3.astype(compute_dtype)
        w_mat = w_mat.astype(compute_dtype)
    b_mat = bias.reshape(C_out, 1).astype(jnp.float32)

    x_it = jnp.dtype(x3.dtype).itemsize
    w_it = jnp.dtype(w_mat.dtype).itemsize
    o_it = jnp.dtype(out_dtype).itemsize

    # ---- generation-aware scoped-VMEM budget (~50% of physical VMEM) ----
    try:
        phys_vmem = int(pltpu.get_tpu_info().vmem_capacity_bytes)
    except Exception:
        phys_vmem = 64 * 1024 * 1024            # conservative fallback (v7x)
    budget = phys_vmem // 2
    headroom = 2 * 1024 * 1024                  # compiler-internal scratch

    # ---- channel tiling: keep the weight block comfortably VMEM-resident ----
    if _block_bytes(C_out, C_in, w_it) <= budget // 3:
        tile_co, tile_ci = C_out, C_in
    else:
        tile_co = C_out if C_out <= 256 else 256
        tile_ci = C_in if C_in <= 512 else _largest_dividing_tile(C_in, 512, 128)
    n_co = pl.cdiv(C_out, tile_co)
    n_k = pl.cdiv(C_in, tile_ci)                # tile_ci divides C_in when tiled
    use_acc = n_k > 1

    # Grid-invariant weight/bias blocks only need a single buffer.
    w_bufs = 1 if (n_co == 1 and n_k == 1) else 2
    b_bufs = 1 if n_co == 1 else 2

    w_blk = _block_bytes(tile_co, tile_ci, w_it)
    b_blk = _block_bytes(tile_co, 1, 4)
    fixed = w_bufs * w_blk + b_bufs * b_blk + headroom

    # Bytes per spatial lane column: double-buffered x + out blocks (+ f32 acc).
    per_lane = (2 * _round_up(tile_ci, 8 * (4 // x_it)) * x_it
                + 2 * _round_up(tile_co, 8 * (4 // o_it)) * o_it)
    if use_acc:
        per_lane += _round_up(tile_co, 8) * 4

    max_tile = max(128, ((budget - fixed) // per_lane) // 128 * 128)

    if HW <= max_tile:
        tile_hw, n_hw = HW, 1
    else:
        n_hw = pl.cdiv(HW, max_tile)
        tile_hw = _round_up(pl.cdiv(HW, n_hw), 128)   # balanced tiles
        n_hw = pl.cdiv(HW, tile_hw)

    # v7x has 2 TensorCores sharded over parallel axes: ensure >= 2 steps.
    if N * n_co * n_hw < 2 and HW >= 256:
        tile_hw = _round_up(pl.cdiv(HW, 2), 128)
        n_hw = pl.cdiv(HW, tile_hw)

    x_blk = _block_bytes(tile_ci, tile_hw, x_it)
    o_blk = _block_bytes(tile_co, tile_hw, o_it)
    acc_blk = _block_bytes(tile_co, tile_hw, 4) if use_acc else 0
    vmem_limit = int(min(budget, max(4 * 1024 * 1024,
                                     2 * (x_blk + o_blk) + fixed + acc_blk)))

    kernel = _conv1x1_acc_kernel if use_acc else _conv1x1_direct_kernel
    scratch = [pltpu.VMEM((tile_co, tile_hw), jnp.float32)] if use_acc else []

    cost = pl.CostEstimate(
        flops=2 * N * C_out * C_in * HW,
        bytes_accessed=(N * C_in * HW * x_it + N * C_out * HW * o_it
                        + C_out * C_in * w_it + C_out * 4),
        transcendentals=0)

    # TODO(synk): on v7x, sweep pipeline_mode=pl.Buffered(3) on the activation
    # input once weight/bias are single-buffered (hides DMA issue latency).
    out3 = pl.pallas_call(
        kernel,
        out_shape=jax.ShapeDtypeStruct((N, C_out, HW), out_dtype),
        grid_spec=pltpu.PrefetchScalarGridSpec(
            num_scalar_prefetch=0,
            grid=(N, n_co, n_hw, n_k),
            in_specs=[
                pl.BlockSpec((1, tile_ci, tile_hw),
                             lambda n, co, hw, k: (n, k, hw)),
                pl.BlockSpec((tile_co, tile_ci),
                             lambda n, co, hw, k: (co, k),
                             pipeline_mode=pl.Buffered(w_bufs)),
                pl.BlockSpec((tile_co, 1),
                             lambda n, co, hw, k: (co, 0),
                             pipeline_mode=pl.Buffered(b_bufs)),
            ],
            out_specs=pl.BlockSpec((1, tile_co, tile_hw),
                                   lambda n, co, hw, k: (n, co, hw)),
            scratch_shapes=scratch,
        ),
        compiler_params=pltpu.CompilerParams(
            dimension_semantics=("parallel", "parallel", "parallel", "arbitrary"),
            vmem_limit_bytes=vmem_limit),
        cost_estimate=cost,
    )(x3, w_mat, b_mat)

    return out3.reshape(N, C_out, H, W)


if __name__ == "__main__":
    key = jax.random.PRNGKey(0)
    k_x, k_w, k_b = jax.random.split(key, 3)

    # small shapes consistent with the module's forward
    N, C_in, H, W = 2, 4, 16, 16
    C_out = 8

    x = jax.random.normal(k_x, (N, C_in, H, W), dtype=jnp.float32)

    # deterministic parameter init (mimics PyTorch Conv2d default uniform bound)
    bound = 1.0 / (C_in ** 0.5)
    weight = jax.random.uniform(k_w, (C_out, C_in), jnp.float32, -bound, bound)
    bias = jax.random.uniform(k_b, (C_out,), jnp.float32, -bound, bound)

    out = bottleneck_block(x, weight, bias)
    jax.block_until_ready(out)

    # correctness check against plain-JAX reference of the 1x1 conv
    ref = jnp.einsum("nchw,oc->nohw", x, weight) + bias[None, :, None, None]
    assert out.shape == (N, C_out, H, W)
    assert jnp.allclose(out, ref, atol=1e-5, rtol=1e-5)

    # optional bf16 streaming path (halves HBM bytes; f32 MXU accumulation)
    out_bf16 = bottleneck_block(x, weight, bias, compute_dtype=jnp.bfloat16)
    jax.block_until_ready(out_bf16)
    assert jnp.allclose(out_bf16, ref, atol=1e-1, rtol=5e-2)

    print("KERNEL_OK")
</pallas_src>

<mosaic_0001>
module attributes {stable_mosaic.version = 11 : i64} {
  func.func @_conv1x1_direct_kernel(%arg0: i32, %arg1: i32, %arg2: i32, %arg3: i32, %arg4: memref<1x4x256xf32, #tpu.memory_space<vmem>>, %arg5: memref<8x4xf32, #tpu.memory_space<vmem>>, %arg6: memref<8x1xf32, #tpu.memory_space<vmem>>, %arg7: memref<1x8x256xf32, #tpu.memory_space<vmem>>) attributes {dimension_semantics = [#tpu.dimension_semantics<parallel>, #tpu.dimension_semantics<parallel>, #tpu.dimension_semantics<parallel>, #tpu.dimension_semantics<arbitrary>], iteration_bounds = array<i64: 2, 1, 1, 1>, scalar_prefetch = 0 : i64, scratch_operands = 0 : i64, tpu.core_type = #tpu.core_type<tc>, window_params = [{transform_indices = @transform_0, window_bounds = array<i64: 1, 4, 256>}, {pipeline_mode = #tpu.pipeline_mode<synchronous>, transform_indices = @transform_1, window_bounds = array<i64: 8, 4>}, {pipeline_mode = #tpu.pipeline_mode<synchronous>, transform_indices = @transform_2, window_bounds = array<i64: 8, 1>}, {transform_indices = @transform_3, window_bounds = array<i64: 1, 8, 256>}]} {
    %c0 = arith.constant 0 : index
    %c0_0 = arith.constant 0 : index
    %0 = vector.load %arg5[%c0, %c0_0] : memref<8x4xf32, #tpu.memory_space<vmem>>, vector<8x4xf32>
    %c0_1 = arith.constant 0 : index
    %c0_2 = arith.constant 0 : index
    %c0_3 = arith.constant 0 : index
    %1 = vector.load %arg4[%c0_1, %c0_2, %c0_3] : memref<1x4x256xf32, #tpu.memory_space<vmem>>, vector<1x4x256xf32>
    %2 = vector.shape_cast %1 : vector<1x4x256xf32> to vector<4x256xf32>
    %cst = arith.constant dense<0.000000e+00> : vector<8x256xf32>
    %3 = tpu.matmul %0, %2, %cst {dimension_numbers = #tpu.dot_dimension_numbers<[1], [0], [0], [1], [0, 0, 1, 1], [], []>} : vector<8x4xf32>, vector<4x256xf32>, vector<8x256xf32> -> vector<8x256xf32>
    %c0_4 = arith.constant 0 : index
    %c0_5 = arith.constant 0 : index
    %4 = vector.load %arg6[%c0_4, %c0_5] : memref<8x1xf32, #tpu.memory_space<vmem>>, vector<8x1xf32>
    %5 = vector.broadcast %4 : vector<8x1xf32> to vector<8x256xf32>
    %6 = arith.addf %3, %5 : vector<8x256xf32>
    %c0_6 = arith.constant 0 : index
    %c0_7 = arith.constant 0 : index
    %c0_8 = arith.constant 0 : index
    %7 = vector.load %arg7[%c0_6, %c0_7, %c0_8] : memref<1x8x256xf32, #tpu.memory_space<vmem>>, vector<1x8x256xf32>
    %8 = vector.shape_cast %7 : vector<1x8x256xf32> to vector<8x256xf32>
    %9 = vector.shape_cast %6 : vector<8x256xf32> to vector<1x8x256xf32>
    tpu.vector_store %arg7[%c0_6, %c0_7, %c0_8], %9 {strides = array<i32>} : memref<1x8x256xf32, #tpu.memory_space<vmem>>, vector<1x8x256xf32>,
    return
  }
  func.func @transform_0(%arg0: i32, %arg1: i32, %arg2: i32, %arg3: i32) -> (i32, i32, i32) {
    %c0_i32 = arith.constant 0 : i32
    return %arg0, %arg3, %arg2 : i32, i32, i32
  }
  func.func @transform_1(%arg0: i32, %arg1: i32, %arg2: i32, %arg3: i32) -> (i32, i32) {
    %c0_i32 = arith.constant 0 : i32
    return %arg1, %arg3 : i32, i32
  }
  func.func @transform_2(%arg0: i32, %arg1: i32, %arg2: i32, %arg3: i32) -> (i32, i32) {
    %c0_i32 = arith.constant 0 : i32
    %c0_i32_0 = arith.constant 0 : i32
    return %arg1, %c0_i32 : i32, i32
  }
  func.func @transform_3(%arg0: i32, %arg1: i32, %arg2: i32, %arg3: i32) -> (i32, i32, i32) {
    %c0_i32 = arith.constant 0 : i32
    return %arg0, %arg1, %arg2 : i32, i32, i32
  }
}

</mosaic_0001>

<bundles_post_ra>
// kernel: bottleneck_block.1
= control target key start
LH: loop header
LB: loop body
LE: loop exit
PB: predicated region body
PF: predicated region fallthrough
CT: control target
= control target key end

     0   :  { %s625_s12 = smov 0   ;;  %s627_s13 = smov 0   ;;  %s664_s0 = inlined_call_operand.vmem [shape: f32[2,4,256], index: 0, kind: input, shape index: {}]   ;;  %s665_s1 = inlined_call_operand.vmem [shape: f32[8,4], index: 1, kind: input, shape index: {}]   ;;  %s666_s2 = inlined_call_operand.vmem [shape: f32[8,1], index: 2, kind: input, shape index: {}]   ;;  %s667_s3 = inlined_call_operand.vmem [shape: f32[2,8,256], index: 3, kind: output, shape index: {}]  }
   0x1   :  { %s629_s14 = smov 0  }
   0x2 LB: > { %s39_s15 = sadd.s32 1, %s597_s13  ;;  %p539_p0 = scmp.ge.s32.totalorder %s601_s14, 1  ;;  %s601_s14 = sphi %s629_s14, %s13_s14   ;;  %s597_s13 = sphi %s627_s13, %s669_s13   ;;  %s593_s12 = sphi %s625_s12, %s668_s12  }
   0x3   : > { %p41_p1 = scmp.ge.s32.totalorder %s39_s15, 2  ;;  %p203_p2 = scmp.lt.s32.totalorder %s601_s14, 3 }
   0x5   : > { %s671_s15 = smov (%p41_p1, %s39_s15), 0  ;;  %p204_p3 = pnand %p539_p0, %p203_p2 }
   0x6   : > { %p255_p4 = scmp.lt.s32.totalorder (!%p204_p3), %s593_s12, 1  ;;  %v603_v0 = vmov (!%p204_p3), 0.0   ;;  %v604_v1 = vmov (!%p204_p3), 0   ;;  %v295_v2 = vld [vmem:[%s666_s2] sm:$0xff] (!%p204_p3)  ;;  %vm307_vm0 = vcmask (!%p204_p3), 1043456   ;;  %vm303_vm1 = vcmask (!%p204_p3), 31744  }
   0x7   : > { %207 = sbr.rel (%p204_p3) target bundleno = 238 (0xee), region = 32  ;;  %376 = vmatprep.mubr.f32.mxu0 (!%p204_p3), %v603_v0  ;;  %577 = vset.pattern.permute.xlu0 (!%p204_p3), %v604_v1  ;;  %v293_v5 = vld [vmem:[%s665_s1] sm:$0xff] (!%p204_p3) }
   0x8   : > { %298 = vperm.xlu0 (!%p204_p3), %577, %v295_v2  }
   0xe   : > { %s673_s12 = smov (!%p255_p4, %s593_s12), 1 }
   0xf   : > { %s549_s18 = sshll.u32 %s673_s12, 3  ;;  %s550_s24 = sshll.u32 %s673_s12, 4 }
  0x10   : > { %s266_s21 = scalar_lea.vmem %s664_s0, %s549_s18  ;;  %s291_s27 = scalar_lea.vmem %s667_s3, %s550_s24 }
  0x11   : > { %v294_v3 = vld [vmem:[%s266_s21] sm:$0xff] }
  0x12   : > { %v302_v4 = vcombine.high %v294_v3, %v294_v3 }
  0x14   : > { %544 = vmatprep.subr.msk.mxu0 %vm307_vm0, %v302_v4 }
  0x15   : > { %545 = vmatpush1.msk.msra.mxu0 %vm307_vm0, %v294_v3 }
  0x16   : > { %546 = vmatmul.mubr.msk.f32.vlgmr.msra.gmra.mrb[0].mxu0 %vm303_vm1, %v293_v5 }
  0x87   : > { %v299_v6 = vpop.permute.xlu0 %298 }
  0xe9   : > { %v378_v7 = vpop.f32.mrb[0].mxu0 }
  0xea   : > { %v379_v8 = vadd.f32 %v378_v7, %v299_v6  ;;  %v380_v9 = vpop.f32.mrb[1].mxu0 }
  0xeb   : > { %v381_v10 = vadd.f32 %v380_v9, %v299_v6 }
  0xec   : > { %383 = vst [vmem:[%s291_s27] sm:$0xff] %v379_v8 }
  0xed   : > { %384 = vst [vmem:[%s291_s27 + $0x8] sm:$0xff] %v381_v10 }
  0xee PF: > { %s13_s14 = sadd.s32 1, %s601_s14   ;;  %s668_s12 = smov %s597_s13 }
  0xef   : > { %p10_p5 = scmp.ge.s32.totalorder %s13_s14, 4   ;;  %s669_s13 = smov %s671_s15 }
  0xf1   :  { %12 = sbr.rel (!%p10_p5) target bundleno = 2 (0x2), region = 68 }

</bundles_post_ra>
